<compile_context>
chip_gen: v6e
topology: v6e:2x2x1
jax: 0.10.0
libtpu: 0.0.40
codegen_flags: <defaults>
</compile_context>

<pallas_src>
import jax
import jax.numpy as jnp
from jax.experimental import pallas as pl
from jax.experimental.pallas import tpu as pltpu

BN_EPS = 1e-5
LANE = 128
VMEM_LIMIT = 48 * 1024 * 1024          # <= 64 MiB v7x VMEM; fine on v5e/v6e


def _round_up(x, m):
    return (x + m - 1) // m * m


def _choose_tm(m, bytes_per_row, cap=1024, budget=24 * 1024 * 1024):
    """Largest power-of-two GEMM row tile in [128, cap] whose double-buffered
       per-step footprint stays under `budget` and that does not over-pad M."""
    tm = 128
    while tm * 2 <= cap and tm < m and 2 * (tm * 2) * bytes_per_row <= budget:
        tm *= 2
    return tm


def _choose_elem_tile(n_tiles, tm, bytes_per_row, budget=16 * 1024 * 1024):
    """Row tile for the elementwise residual pass: largest multiple of `tm`
       that divides the padded row count and fits the VMEM budget."""
    best = 1
    for k in range(1, n_tiles + 1):
        if n_tiles % k == 0 and 2 * (k * tm) * bytes_per_row <= budget:
            best = k
    return best * tm


# ---------------------------------------------------------------------------
# Pallas kernels
# ---------------------------------------------------------------------------
def conv_stats_kernel(p_ref, w_ref, z_ref, s_ref, q_ref):
    """One (chunk, tile) step of an im2col GEMM + BN statistics.
       z = patches @ W on the MXU (bf16 x bf16 -> fp32), stored as bf16;
       per-channel sum / sum-of-squares accumulated in fp32 into this chunk's
       resident stat block (init on the chunk's first tile)."""
    @pl.when(pl.program_id(1) == 0)
    def _init():
        s_ref[...] = jnp.zeros_like(s_ref)
        q_ref[...] = jnp.zeros_like(q_ref)

    z = jnp.dot(p_ref[...], w_ref[...], preferred_element_type=jnp.float32)
    z_ref[...] = z.astype(z_ref.dtype)                       # bf16 HBM store
    s_ref[...] += jnp.sum(z, axis=0, keepdims=True).reshape(s_ref.shape)
    q_ref[...] += jnp.sum(z * z, axis=0, keepdims=True).reshape(q_ref.shape)


def residual_kernel(z1b_ref, z12_ref, sc1b_ref, sh1b_ref, sc2_ref, sh2_ref,
                    o_ref):
    """out = ReLU(BN1b(z1b) + BN2(z2)), each BN folded to scale/shift.
       z2 lives in the first `cout` lanes of the packed z12 tile (scale/shift
       vectors for the packed half beyond cout are zero)."""
    cp = o_ref.shape[-1]
    a = z1b_ref[...].astype(jnp.float32) * sc1b_ref[...] + sh1b_ref[...]
    b = z12_ref[...].astype(jnp.float32) * sc2_ref[...] + sh2_ref[...]
    o_ref[...] = jnp.maximum(a + b[:, :cp], 0.0)


# ---------------------------------------------------------------------------
# Glue: im2col / packing / BN folding (plain JAX, fused under jit)
# ---------------------------------------------------------------------------
def im2col_3x3(x_nhwc, stride):
    """3x3 / pad=1 patches: (N,H,W,C) -> (N*Ho*Wo, 9*C), (kh, kw, ci) order."""
    N, H, W, C = x_nhwc.shape
    Ho = (H + 2 - 3) // stride + 1
    Wo = (W + 2 - 3) // stride + 1
    xp = jnp.pad(x_nhwc, ((0, 0), (1, 1), (1, 1), (0, 0)))
    cols = []
    for kh in range(3):
        for kw in range(3):
            cols.append(xp[:,
                           kh:kh + (Ho - 1) * stride + 1:stride,
                           kw:kw + (Wo - 1) * stride + 1:stride,
                           :])
    patches = jnp.stack(cols, axis=3)                   # (N, Ho, Wo, 9, C)
    return patches.reshape(N * Ho * Wo, 9 * C)


def _conv_weight_mat(w_pt):
    """(Cout, Cin, 3, 3) -> (9*Cin, Cout) GEMM weight, (kh, kw, ci) rows."""
    cout = w_pt.shape[0]
    return jnp.transpose(w_pt, (2, 3, 1, 0)).reshape(-1, cout)


def _pad2d(a, rows, cols):
    return jnp.pad(a, ((0, rows - a.shape[0]), (0, cols - a.shape[1])))


def bn_scale_shift(s, q, gamma, beta, count):
    """Fold training-mode BN (batch stats, biased var) + gamma/beta into a
       per-channel fp32 scale/shift."""
    mean = s / count
    var = jnp.maximum(q / count - mean * mean, 0.0)
    scale = gamma * jax.lax.rsqrt(var + BN_EPS)
    shift = beta - mean * scale
    return scale, shift


# ---------------------------------------------------------------------------
# Forward pass
# ---------------------------------------------------------------------------
def res2d_block_forward(x_nchw, params, stride=2):
    """Forward pass of Res2dBlock.  x_nchw: (N, Cin, H, W) float32, NCHW."""
    x = jnp.transpose(x_nchw, (0, 2, 3, 1)).astype(jnp.float32)   # -> NHWC
    N, H, W, cin = x.shape
    cout = params["w1a"].shape[0]

    Ho = (H + 2 - 3) // stride + 1
    Wo = (W + 2 - 3) // stride + 1
    M = N * Ho * Wo

    K1p = _round_up(9 * cin, 16)           # bf16 sublane-packed K (no 128 pad)
    K2p = _round_up(9 * cout, 16)
    Cp = _round_up(cout, LANE)             # lane-dense single-conv channels
    Cp2 = _round_up(2 * cout, LANE)        # packed [conv2 | conv1a] channels

    # ---- tiling -------------------------------------------------------------
    gemm_row_bytes = max(K1p * 2 + Cp2 * 2, K2p * 2 + Cp * 2)
    TM = _choose_tm(M, gemm_row_bytes)
    n_tiles = -(-M // TM)
    n_chunks = 2 if n_tiles >= 2 else 1    # v7x dual-TC; harmless on v5e/v6e
    Mp = _round_up(M, n_chunks * TM)       # zero rows -> zero z -> stats exact
    TPC = Mp // (n_chunks * TM)            # tiles per chunk
    n_tiles_total = Mp // TM

    elem_row_bytes = Cp2 * 2 + Cp * 2 + Cp * 4
    TM3 = _choose_elem_tile(n_tiles_total, TM, elem_row_bytes)
    n_tiles3 = Mp // TM3

    params_gemm = pltpu.CompilerParams(
        dimension_semantics=("parallel", "arbitrary"),
        vmem_limit_bytes=VMEM_LIMIT)
    params_elem = pltpu.CompilerParams(
        dimension_semantics=("parallel",),
        vmem_limit_bytes=VMEM_LIMIT)

    # ---- packed / padded operands (bf16 for the MXU) ------------------------
    p1 = _pad2d(im2col_3x3(x, stride), Mp, K1p).astype(jnp.bfloat16)
    # Packed weights: columns [0,cout) = conv2, [cout,2*cout) = conv1a.
    w12 = jnp.concatenate(
        [_conv_weight_mat(params["w2"]), _conv_weight_mat(params["w1a"])],
        axis=1)
    w12 = _pad2d(w12, K1p, Cp2).astype(jnp.bfloat16)
    w1b = _pad2d(_conv_weight_mat(params["w1b"]), K2p, Cp).astype(jnp.bfloat16)
    # NOTE: conv biases are intentionally unused — each conv is immediately
    # followed by training-mode BN whose mean subtraction cancels them.

    # ---- stage 1: both stride-`stride` convs in one packed GEMM + stats -----
    z12, s12, q12 = pl.pallas_call(
        conv_stats_kernel,
        grid=(n_chunks, TPC),
        in_specs=[pl.BlockSpec((TM, K1p), lambda c, i: (c * TPC + i, 0)),
                  pl.BlockSpec((K1p, Cp2), lambda c, i: (0, 0))],
        out_specs=(pl.BlockSpec((TM, Cp2), lambda c, i: (c * TPC + i, 0)),
                   pl.BlockSpec((1, 1, Cp2), lambda c, i: (c, 0, 0)),
                   pl.BlockSpec((1, 1, Cp2), lambda c, i: (c, 0, 0))),
        out_shape=(jax.ShapeDtypeStruct((Mp, Cp2), jnp.bfloat16),
                   jax.ShapeDtypeStruct((n_chunks, 1, Cp2), jnp.float32),
                   jax.ShapeDtypeStruct((n_chunks, 1, Cp2), jnp.float32)),
        compiler_params=params_gemm,
    )(p1, w12)

    count = jnp.float32(M)                         # true rows (pad rows are 0)
    s12c = jnp.sum(s12, axis=0)[0]                 # combine per-chunk partials
    q12c = jnp.sum(q12, axis=0)[0]
    sc2, sh2 = bn_scale_shift(s12c[:cout], q12c[:cout],
                              params["g2"], params["be2"], count)
    sc1a, sh1a = bn_scale_shift(s12c[cout:2 * cout], q12c[cout:2 * cout],
                                params["g1a"], params["be1a"], count)

    # ---- y1 = ReLU(BN1a(z1)) fused (by XLA) into the im2col of conv1b -------
    z1 = z12[:M, cout:2 * cout].astype(jnp.float32)
    y1 = jnp.maximum(z1 * sc1a[None, :] + sh1a[None, :], 0.0)
    y1_nhwc = y1.astype(jnp.bfloat16).reshape(N, Ho, Wo, cout)
    p2 = _pad2d(im2col_3x3(y1_nhwc, 1), Mp, K2p)

    # ---- stage 2: stride-1 conv on y1 + BN statistics ------------------------
    z1b, s1b, q1b = pl.pallas_call(
        conv_stats_kernel,
        grid=(n_chunks, TPC),
        in_specs=[pl.BlockSpec((TM, K2p), lambda c, i: (c * TPC + i, 0)),
                  pl.BlockSpec((K2p, Cp), lambda c, i: (0, 0))],
        out_specs=(pl.BlockSpec((TM, Cp), lambda c, i: (c * TPC + i, 0)),
                   pl.BlockSpec((1, 1, Cp), lambda c, i: (c, 0, 0)),
                   pl.BlockSpec((1, 1, Cp), lambda c, i: (c, 0, 0))),
        out_shape=(jax.ShapeDtypeStruct((Mp, Cp), jnp.bfloat16),
                   jax.ShapeDtypeStruct((n_chunks, 1, Cp), jnp.float32),
                   jax.ShapeDtypeStruct((n_chunks, 1, Cp), jnp.float32)),
        compiler_params=params_gemm,
    )(p2, w1b)

    s1bc = jnp.sum(s1b, axis=0)[0]
    q1bc = jnp.sum(q1b, axis=0)[0]
    sc1b, sh1b = bn_scale_shift(s1bc[:cout], q1bc[:cout],
                                params["g1b"], params["be1b"], count)

    # ---- stage 3: out = ReLU(BN1b(z1b) + BN2(z2)) ----------------------------
    def row(v, width):
        return jnp.pad(v.astype(jnp.float32), (0, width - v.shape[0])
                       ).reshape(1, width)

    sc2_row, sh2_row = row(sc2, Cp2), row(sh2, Cp2)      # zero past cout
    sc1b_row, sh1b_row = row(sc1b, Cp), row(sh1b, Cp)

    out = pl.pallas_call(
        residual_kernel,
        grid=(n_tiles3,),
        in_specs=[pl.BlockSpec((TM3, Cp), lambda i: (i, 0)),
                  pl.BlockSpec((TM3, Cp2), lambda i: (i, 0)),
                  pl.BlockSpec((1, Cp), lambda i: (0, 0)),
                  pl.BlockSpec((1, Cp), lambda i: (0, 0)),
                  pl.BlockSpec((1, Cp2), lambda i: (0, 0)),
                  pl.BlockSpec((1, Cp2), lambda i: (0, 0))],
        out_specs=pl.BlockSpec((TM3, Cp), lambda i: (i, 0)),
        out_shape=jax.ShapeDtypeStruct((Mp, Cp), jnp.float32),
        compiler_params=params_elem,
    )(z1b, z12, sc1b_row, sh1b_row, sc2_row, sh2_row)

    out = out[:M, :cout].reshape(N, Ho, Wo, cout)
    return jnp.transpose(out, (0, 3, 1, 2))               # NHWC -> NCHW


# ---------------------------------------------------------------------------
# Deterministic parameter construction (same shapes as the PyTorch module)
# ---------------------------------------------------------------------------
def make_params(key, cin, cout):
    ks = jax.random.split(key, 3)

    def conv(k, ci, co):
        kw_, kb_ = jax.random.split(k)
        w = 0.1 * jax.random.normal(kw_, (co, ci, 3, 3), jnp.float32)
        b = 0.1 * jax.random.normal(kb_, (co,), jnp.float32)
        return w, b

    w1a, b1a = conv(ks[0], cin, cout)    # conv_block_1[0]
    w1b, b1b = conv(ks[1], cout, cout)   # conv_block_1[3]
    w2, b2 = conv(ks[2], cin, cout)      # conv_block_2[0]
    ones = jnp.ones((cout,), jnp.float32)
    zeros = jnp.zeros((cout,), jnp.float32)
    # Biases kept for parameter parity with nn.Conv2d(bias=True) but unused:
    # training-mode BN's mean subtraction cancels them exactly.
    return dict(w1a=w1a, b1a=b1a, g1a=ones, be1a=zeros,
                w1b=w1b, b1b=b1b, g1b=ones, be1b=zeros,
                w2=w2, b2=b2, g2=ones, be2=zeros)


if __name__ == "__main__":
    key = jax.random.PRNGKey(0)
    k_x, k_p = jax.random.split(key)

    N, Cin, H, W = 2, 4, 16, 16
    Cout, stride = 8, 2

    x = jax.random.normal(k_x, (N, Cin, H, W), jnp.float32)
    params = make_params(k_p, Cin, Cout)

    fwd = jax.jit(res2d_block_forward, static_argnames=("stride",))
    out = fwd(x, params, stride=stride)
    jax.block_until_ready(out)
    assert out.shape == (N, Cout, H // stride, W // stride), out.shape
    print("KERNEL_OK")
</pallas_src>

<mosaic_0001>
module attributes {stable_mosaic.version = 11 : i64} {
  func.func @conv_stats_kernel(%arg0: i32, %arg1: i32, %arg2: memref<128x48xbf16, #tpu.memory_space<vmem>>, %arg3: memref<48x128xbf16, #tpu.memory_space<vmem>>, %arg4: memref<128x128xbf16, #tpu.memory_space<vmem>>, %arg5: memref<1x1x128xf32, #tpu.memory_space<vmem>>, %arg6: memref<1x1x128xf32, #tpu.memory_space<vmem>>) attributes {dimension_semantics = [#tpu.dimension_semantics<parallel>, #tpu.dimension_semantics<arbitrary>], iteration_bounds = array<i64: 1, 1>, scalar_prefetch = 0 : i64, scratch_operands = 0 : i64, tpu.core_type = #tpu.core_type<tc>, window_params = [{transform_indices = @transform_0, window_bounds = array<i64: 128, 48>}, {pipeline_mode = #tpu.pipeline_mode<synchronous>, transform_indices = @transform_1, window_bounds = array<i64: 48, 128>}, {transform_indices = @transform_2, window_bounds = array<i64: 128, 128>}, {transform_indices = @transform_3, window_bounds = array<i64: 1, 1, 128>}, {transform_indices = @transform_4, window_bounds = array<i64: 1, 1, 128>}]} {
    %c0_i32 = arith.constant 0 : i32
    %0 = arith.cmpi eq, %arg1, %c0_i32 : i32
    %1 = arith.extui %0 : i1 to i32
    %c0_i32_0 = arith.constant 0 : i32
    %2 = arith.cmpi ne, %1, %c0_i32_0 : i32
    scf.if %2 {
      %cst_20 = arith.constant 0.000000e+00 : f32
      %21 = vector.broadcast %cst_20 : f32 to vector<1x1x128xf32>
      %c0_21 = arith.constant 0 : index
      %c0_22 = arith.constant 0 : index
      %c0_23 = arith.constant 0 : index
      %22 = vector.load %arg5[%c0_21, %c0_22, %c0_23] : memref<1x1x128xf32, #tpu.memory_space<vmem>>, vector<1x1x128xf32>
      tpu.vector_store %arg5[%c0_21, %c0_22, %c0_23], %21 {strides = array<i32>} : memref<1x1x128xf32, #tpu.memory_space<vmem>>, vector<1x1x128xf32>,
      %cst_24 = arith.constant 0.000000e+00 : f32
      %23 = vector.broadcast %cst_24 : f32 to vector<1x1x128xf32>
      %c0_25 = arith.constant 0 : index
      %c0_26 = arith.constant 0 : index
      %c0_27 = arith.constant 0 : index
      %24 = vector.load %arg6[%c0_25, %c0_26, %c0_27] : memref<1x1x128xf32, #tpu.memory_space<vmem>>, vector<1x1x128xf32>
      tpu.vector_store %arg6[%c0_25, %c0_26, %c0_27], %23 {strides = array<i32>} : memref<1x1x128xf32, #tpu.memory_space<vmem>>, vector<1x1x128xf32>,
    } else {
    }
    %c0 = arith.constant 0 : index
    %c0_1 = arith.constant 0 : index
    %3 = vector.load %arg2[%c0, %c0_1] : memref<128x48xbf16, #tpu.memory_space<vmem>>, vector<128x48xbf16>
    %c0_2 = arith.constant 0 : index
    %c0_3 = arith.constant 0 : index
    %4 = vector.load %arg3[%c0_2, %c0_3] : memref<48x128xbf16, #tpu.memory_space<vmem>>, vector<48x128xbf16>
    %cst = arith.constant dense<0.000000e+00> : vector<128x128xf32>
    %5 = tpu.matmul %3, %4, %cst {dimension_numbers = #tpu.dot_dimension_numbers<[1], [0], [0], [1], [0, 0, 1, 1], [], []>} : vector<128x48xbf16>, vector<48x128xbf16>, vector<128x128xf32> -> vector<128x128xf32>
    %6 = arith.truncf %5 : vector<128x128xf32> to vector<128x128xbf16>
    %c0_4 = arith.constant 0 : index
    %c0_5 = arith.constant 0 : index
    %7 = vector.load %arg4[%c0_4, %c0_5] : memref<128x128xbf16, #tpu.memory_space<vmem>>, vector<128x128xbf16>
    tpu.vector_store %arg4[%c0_4, %c0_5], %6 {strides = array<i32>} : memref<128x128xbf16, #tpu.memory_space<vmem>>, vector<128x128xbf16>,
    %c0_6 = arith.constant 0 : index
    %c0_7 = arith.constant 0 : index
    %c0_8 = arith.constant 0 : index
    %8 = vector.load %arg5[%c0_6, %c0_7, %c0_8] : memref<1x1x128xf32, #tpu.memory_space<vmem>>, vector<1x1x128xf32>
    %cst_9 = arith.constant dense<0.000000e+00> : vector<128xf32>
    %9 = vector.multi_reduction <add>, %5, %cst_9 [0] : vector<128x128xf32> to vector<128xf32>
    %10 = vector.shape_cast %9 : vector<128xf32> to vector<1x128xf32>
    %11 = vector.shape_cast %10 : vector<1x128xf32> to vector<1x1x128xf32>
    %12 = arith.addf %8, %11 : vector<1x1x128xf32>
    %c0_10 = arith.constant 0 : index
    %c0_11 = arith.constant 0 : index
    %c0_12 = arith.constant 0 : index
    %13 = vector.load %arg5[%c0_10, %c0_11, %c0_12] : memref<1x1x128xf32, #tpu.memory_space<vmem>>, vector<1x1x128xf32>
    tpu.vector_store %arg5[%c0_10, %c0_11, %c0_12], %12 {strides = array<i32>} : memref<1x1x128xf32, #tpu.memory_space<vmem>>, vector<1x1x128xf32>,
    %c0_13 = arith.constant 0 : index
    %c0_14 = arith.constant 0 : index
    %c0_15 = arith.constant 0 : index
    %14 = vector.load %arg6[%c0_13, %c0_14, %c0_15] : memref<1x1x128xf32, #tpu.memory_space<vmem>>, vector<1x1x128xf32>
    %15 = arith.mulf %5, %5 : vector<128x128xf32>
    %cst_16 = arith.constant dense<0.000000e+00> : vector<128xf32>
    %16 = vector.multi_reduction <add>, %15, %cst_16 [0] : vector<128x128xf32> to vector<128xf32>
    %17 = vector.shape_cast %16 : vector<128xf32> to vector<1x128xf32>
    %18 = vector.shape_cast %17 : vector<1x128xf32> to vector<1x1x128xf32>
    %19 = arith.addf %14, %18 : vector<1x1x128xf32>
    %c0_17 = arith.constant 0 : index
    %c0_18 = arith.constant 0 : index
    %c0_19 = arith.constant 0 : index
    %20 = vector.load %arg6[%c0_17, %c0_18, %c0_19] : memref<1x1x128xf32, #tpu.memory_space<vmem>>, vector<1x1x128xf32>
    tpu.vector_store %arg6[%c0_17, %c0_18, %c0_19], %19 {strides = array<i32>} : memref<1x1x128xf32, #tpu.memory_space<vmem>>, vector<1x1x128xf32>,
    return
  }
  func.func @transform_0(%arg0: i32, %arg1: i32) -> (i32, i32) {
    %c1_i32 = arith.constant 1 : i32
    %0 = arith.muli %arg0, %c1_i32 : i32
    %1 = arith.addi %0, %arg1 : i32
    %c0_i32 = arith.constant 0 : i32
    %c0_i32_0 = arith.constant 0 : i32
    return %1, %c0_i32 : i32, i32
  }
  func.func @transform_1(%arg0: i32, %arg1: i32) -> (i32, i32) {
    %c0_i32 = arith.constant 0 : i32
    %c0_i32_0 = arith.constant 0 : i32
    %c0_i32_1 = arith.constant 0 : i32
    return %c0_i32, %c0_i32_0 : i32, i32
  }
  func.func @transform_2(%arg0: i32, %arg1: i32) -> (i32, i32) {
    %c1_i32 = arith.constant 1 : i32
    %0 = arith.muli %arg0, %c1_i32 : i32
    %1 = arith.addi %0, %arg1 : i32
    %c0_i32 = arith.constant 0 : i32
    %c0_i32_0 = arith.constant 0 : i32
    return %1, %c0_i32 : i32, i32
  }
  func.func @transform_3(%arg0: i32, %arg1: i32) -> (i32, i32, i32) {
    %c0_i32 = arith.constant 0 : i32
    %c0_i32_0 = arith.constant 0 : i32
    %c0_i32_1 = arith.constant 0 : i32
    return %arg0, %c0_i32, %c0_i32_0 : i32, i32, i32
  }
  func.func @transform_4(%arg0: i32, %arg1: i32) -> (i32, i32, i32) {
    %c0_i32 = arith.constant 0 : i32
    %c0_i32_0 = arith.constant 0 : i32
    %c0_i32_1 = arith.constant 0 : i32
    return %arg0, %c0_i32, %c0_i32_0 : i32, i32, i32
  }
}

module attributes {stable_mosaic.version = 11 : i64} {
  func.func @conv_stats_kernel(%arg0: i32, %arg1: i32, %arg2: memref<128x80xbf16, #tpu.memory_space<vmem>>, %arg3: memref<80x128xbf16, #tpu.memory_space<vmem>>, %arg4: memref<128x128xbf16, #tpu.memory_space<vmem>>, %arg5: memref<1x1x128xf32, #tpu.memory_space<vmem>>, %arg6: memref<1x1x128xf32, #tpu.memory_space<vmem>>) attributes {dimension_semantics = [#tpu.dimension_semantics<parallel>, #tpu.dimension_semantics<arbitrary>], iteration_bounds = array<i64: 1, 1>, scalar_prefetch = 0 : i64, scratch_operands = 0 : i64, tpu.core_type = #tpu.core_type<tc>, window_params = [{transform_indices = @transform_0, window_bounds = array<i64: 128, 80>}, {pipeline_mode = #tpu.pipeline_mode<synchronous>, transform_indices = @transform_1, window_bounds = array<i64: 80, 128>}, {transform_indices = @transform_2, window_bounds = array<i64: 128, 128>}, {transform_indices = @transform_3, window_bounds = array<i64: 1, 1, 128>}, {transform_indices = @transform_4, window_bounds = array<i64: 1, 1, 128>}]} {
    %c0_i32 = arith.constant 0 : i32
    %0 = arith.cmpi eq, %arg1, %c0_i32 : i32
    %1 = arith.extui %0 : i1 to i32
    %c0_i32_0 = arith.constant 0 : i32
    %2 = arith.cmpi ne, %1, %c0_i32_0 : i32
    scf.if %2 {
      %cst_20 = arith.constant 0.000000e+00 : f32
      %21 = vector.broadcast %cst_20 : f32 to vector<1x1x128xf32>
      %c0_21 = arith.constant 0 : index
      %c0_22 = arith.constant 0 : index
      %c0_23 = arith.constant 0 : index
      %22 = vector.load %arg5[%c0_21, %c0_22, %c0_23] : memref<1x1x128xf32, #tpu.memory_space<vmem>>, vector<1x1x128xf32>
      tpu.vector_store %arg5[%c0_21, %c0_22, %c0_23], %21 {strides = array<i32>} : memref<1x1x128xf32, #tpu.memory_space<vmem>>, vector<1x1x128xf32>,
      %cst_24 = arith.constant 0.000000e+00 : f32
      %23 = vector.broadcast %cst_24 : f32 to vector<1x1x128xf32>
      %c0_25 = arith.constant 0 : index
      %c0_26 = arith.constant 0 : index
      %c0_27 = arith.constant 0 : index
      %24 = vector.load %arg6[%c0_25, %c0_26, %c0_27] : memref<1x1x128xf32, #tpu.memory_space<vmem>>, vector<1x1x128xf32>
      tpu.vector_store %arg6[%c0_25, %c0_26, %c0_27], %23 {strides = array<i32>} : memref<1x1x128xf32, #tpu.memory_space<vmem>>, vector<1x1x128xf32>,
    } else {
    }
    %c0 = arith.constant 0 : index
    %c0_1 = arith.constant 0 : index
    %3 = vector.load %arg2[%c0, %c0_1] : memref<128x80xbf16, #tpu.memory_space<vmem>>, vector<128x80xbf16>
    %c0_2 = arith.constant 0 : index
    %c0_3 = arith.constant 0 : index
    %4 = vector.load %arg3[%c0_2, %c0_3] : memref<80x128xbf16, #tpu.memory_space<vmem>>, vector<80x128xbf16>
    %cst = arith.constant dense<0.000000e+00> : vector<128x128xf32>
    %5 = tpu.matmul %3, %4, %cst {dimension_numbers = #tpu.dot_dimension_numbers<[1], [0], [0], [1], [0, 0, 1, 1], [], []>} : vector<128x80xbf16>, vector<80x128xbf16>, vector<128x128xf32> -> vector<128x128xf32>
    %6 = arith.truncf %5 : vector<128x128xf32> to vector<128x128xbf16>
    %c0_4 = arith.constant 0 : index
    %c0_5 = arith.constant 0 : index
    %7 = vector.load %arg4[%c0_4, %c0_5] : memref<128x128xbf16, #tpu.memory_space<vmem>>, vector<128x128xbf16>
    tpu.vector_store %arg4[%c0_4, %c0_5], %6 {strides = array<i32>} : memref<128x128xbf16, #tpu.memory_space<vmem>>, vector<128x128xbf16>,
    %c0_6 = arith.constant 0 : index
    %c0_7 = arith.constant 0 : index
    %c0_8 = arith.constant 0 : index
    %8 = vector.load %arg5[%c0_6, %c0_7, %c0_8] : memref<1x1x128xf32, #tpu.memory_space<vmem>>, vector<1x1x128xf32>
    %cst_9 = arith.constant dense<0.000000e+00> : vector<128xf32>
    %9 = vector.multi_reduction <add>, %5, %cst_9 [0] : vector<128x128xf32> to vector<128xf32>
    %10 = vector.shape_cast %9 : vector<128xf32> to vector<1x128xf32>
    %11 = vector.shape_cast %10 : vector<1x128xf32> to vector<1x1x128xf32>
    %12 = arith.addf %8, %11 : vector<1x1x128xf32>
    %c0_10 = arith.constant 0 : index
    %c0_11 = arith.constant 0 : index
    %c0_12 = arith.constant 0 : index
    %13 = vector.load %arg5[%c0_10, %c0_11, %c0_12] : memref<1x1x128xf32, #tpu.memory_space<vmem>>, vector<1x1x128xf32>
    tpu.vector_store %arg5[%c0_10, %c0_11, %c0_12], %12 {strides = array<i32>} : memref<1x1x128xf32, #tpu.memory_space<vmem>>, vector<1x1x128xf32>,
    %c0_13 = arith.constant 0 : index
    %c0_14 = arith.constant 0 : index
    %c0_15 = arith.constant 0 : index
    %14 = vector.load %arg6[%c0_13, %c0_14, %c0_15] : memref<1x1x128xf32, #tpu.memory_space<vmem>>, vector<1x1x128xf32>
    %15 = arith.mulf %5, %5 : vector<128x128xf32>
    %cst_16 = arith.constant dense<0.000000e+00> : vector<128xf32>
    %16 = vector.multi_reduction <add>, %15, %cst_16 [0] : vector<128x128xf32> to vector<128xf32>
    %17 = vector.shape_cast %16 : vector<128xf32> to vector<1x128xf32>
    %18 = vector.shape_cast %17 : vector<1x128xf32> to vector<1x1x128xf32>
    %19 = arith.addf %14, %18 : vector<1x1x128xf32>
    %c0_17 = arith.constant 0 : index
    %c0_18 = arith.constant 0 : index
    %c0_19 = arith.constant 0 : index
    %20 = vector.load %arg6[%c0_17, %c0_18, %c0_19] : memref<1x1x128xf32, #tpu.memory_space<vmem>>, vector<1x1x128xf32>
    tpu.vector_store %arg6[%c0_17, %c0_18, %c0_19], %19 {strides = array<i32>} : memref<1x1x128xf32, #tpu.memory_space<vmem>>, vector<1x1x128xf32>,
    return
  }
  func.func @transform_0(%arg0: i32, %arg1: i32) -> (i32, i32) {
    %c1_i32 = arith.constant 1 : i32
    %0 = arith.muli %arg0, %c1_i32 : i32
    %1 = arith.addi %0, %arg1 : i32
    %c0_i32 = arith.constant 0 : i32
    %c0_i32_0 = arith.constant 0 : i32
    return %1, %c0_i32 : i32, i32
  }
  func.func @transform_1(%arg0: i32, %arg1: i32) -> (i32, i32) {
    %c0_i32 = arith.constant 0 : i32
    %c0_i32_0 = arith.constant 0 : i32
    %c0_i32_1 = arith.constant 0 : i32
    return %c0_i32, %c0_i32_0 : i32, i32
  }
  func.func @transform_2(%arg0: i32, %arg1: i32) -> (i32, i32) {
    %c1_i32 = arith.constant 1 : i32
    %0 = arith.muli %arg0, %c1_i32 : i32
    %1 = arith.addi %0, %arg1 : i32
    %c0_i32 = arith.constant 0 : i32
    %c0_i32_0 = arith.constant 0 : i32
    return %1, %c0_i32 : i32, i32
  }
  func.func @transform_3(%arg0: i32, %arg1: i32) -> (i32, i32, i32) {
    %c0_i32 = arith.constant 0 : i32
    %c0_i32_0 = arith.constant 0 : i32
    %c0_i32_1 = arith.constant 0 : i32
    return %arg0, %c0_i32, %c0_i32_0 : i32, i32, i32
  }
  func.func @transform_4(%arg0: i32, %arg1: i32) -> (i32, i32, i32) {
    %c0_i32 = arith.constant 0 : i32
    %c0_i32_0 = arith.constant 0 : i32
    %c0_i32_1 = arith.constant 0 : i32
    return %arg0, %c0_i32, %c0_i32_0 : i32, i32, i32
  }
}

module attributes {stable_mosaic.version = 11 : i64} {
  func.func @residual_kernel(%arg0: i32, %arg1: memref<128x128xbf16, #tpu.memory_space<vmem>>, %arg2: memref<128x128xbf16, #tpu.memory_space<vmem>>, %arg3: memref<1x128xf32, #tpu.memory_space<vmem>>, %arg4: memref<1x128xf32, #tpu.memory_space<vmem>>, %arg5: memref<1x128xf32, #tpu.memory_space<vmem>>, %arg6: memref<1x128xf32, #tpu.memory_space<vmem>>, %arg7: memref<128x128xf32, #tpu.memory_space<vmem>>) attributes {dimension_semantics = [#tpu.dimension_semantics<parallel>], iteration_bounds = array<i64: 1>, scalar_prefetch = 0 : i64, scratch_operands = 0 : i64, tpu.core_type = #tpu.core_type<tc>, window_params = [{transform_indices = @transform_0, window_bounds = array<i64: 128, 128>}, {transform_indices = @transform_1, window_bounds = array<i64: 128, 128>}, {pipeline_mode = #tpu.pipeline_mode<synchronous>, transform_indices = @transform_2, window_bounds = array<i64: 1, 128>}, {pipeline_mode = #tpu.pipeline_mode<synchronous>, transform_indices = @transform_3, window_bounds = array<i64: 1, 128>}, {pipeline_mode = #tpu.pipeline_mode<synchronous>, transform_indices = @transform_4, window_bounds = array<i64: 1, 128>}, {pipeline_mode = #tpu.pipeline_mode<synchronous>, transform_indices = @transform_5, window_bounds = array<i64: 1, 128>}, {transform_indices = @transform_6, window_bounds = array<i64: 128, 128>}]} {
    %c0 = arith.constant 0 : index
    %c0_0 = arith.constant 0 : index
    %0 = vector.load %arg1[%c0, %c0_0] : memref<128x128xbf16, #tpu.memory_space<vmem>>, vector<128x128xbf16>
    %1 = arith.extf %0 : vector<128x128xbf16> to vector<128x128xf32>
    %c0_1 = arith.constant 0 : index
    %c0_2 = arith.constant 0 : index
    %2 = vector.load %arg3[%c0_1, %c0_2] : memref<1x128xf32, #tpu.memory_space<vmem>>, vector<1x128xf32>
    %3 = vector.broadcast %2 : vector<1x128xf32> to vector<128x128xf32>
    %4 = arith.mulf %1, %3 : vector<128x128xf32>
    %c0_3 = arith.constant 0 : index
    %c0_4 = arith.constant 0 : index
    %5 = vector.load %arg4[%c0_3, %c0_4] : memref<1x128xf32, #tpu.memory_space<vmem>>, vector<1x128xf32>
    %6 = vector.broadcast %5 : vector<1x128xf32> to vector<128x128xf32>
    %7 = arith.addf %4, %6 : vector<128x128xf32>
    %c0_5 = arith.constant 0 : index
    %c0_6 = arith.constant 0 : index
    %8 = vector.load %arg2[%c0_5, %c0_6] : memref<128x128xbf16, #tpu.memory_space<vmem>>, vector<128x128xbf16>
    %9 = arith.extf %8 : vector<128x128xbf16> to vector<128x128xf32>
    %c0_7 = arith.constant 0 : index
    %c0_8 = arith.constant 0 : index
    %10 = vector.load %arg5[%c0_7, %c0_8] : memref<1x128xf32, #tpu.memory_space<vmem>>, vector<1x128xf32>
    %11 = vector.broadcast %10 : vector<1x128xf32> to vector<128x128xf32>
    %12 = arith.mulf %9, %11 : vector<128x128xf32>
    %c0_9 = arith.constant 0 : index
    %c0_10 = arith.constant 0 : index
    %13 = vector.load %arg6[%c0_9, %c0_10] : memref<1x128xf32, #tpu.memory_space<vmem>>, vector<1x128xf32>
    %14 = vector.broadcast %13 : vector<1x128xf32> to vector<128x128xf32>
    %15 = arith.addf %12, %14 : vector<128x128xf32>
    %16 = arith.addf %7, %15 : vector<128x128xf32>
    %cst = arith.constant 0.000000e+00 : f32
    %17 = vector.broadcast %cst : f32 to vector<128x128xf32>
    %18 = arith.maximumf %16, %17 : vector<128x128xf32>
    %c0_11 = arith.constant 0 : index
    %c0_12 = arith.constant 0 : index
    %19 = vector.load %arg7[%c0_11, %c0_12] : memref<128x128xf32, #tpu.memory_space<vmem>>, vector<128x128xf32>
    tpu.vector_store %arg7[%c0_11, %c0_12], %18 {strides = array<i32>} : memref<128x128xf32, #tpu.memory_space<vmem>>, vector<128x128xf32>,
    return
  }
  func.func @transform_0(%arg0: i32) -> (i32, i32) {
    %c0_i32 = arith.constant 0 : i32
    %c0_i32_0 = arith.constant 0 : i32
    return %arg0, %c0_i32 : i32, i32
  }
  func.func @transform_1(%arg0: i32) -> (i32, i32) {
    %c0_i32 = arith.constant 0 : i32
    %c0_i32_0 = arith.constant 0 : i32
    return %arg0, %c0_i32 : i32, i32
  }
  func.func @transform_2(%arg0: i32) -> (i32, i32) {
    %c0_i32 = arith.constant 0 : i32
    %c0_i32_0 = arith.constant 0 : i32
    %c0_i32_1 = arith.constant 0 : i32
    return %c0_i32, %c0_i32_0 : i32, i32
  }
  func.func @transform_3(%arg0: i32) -> (i32, i32) {
    %c0_i32 = arith.constant 0 : i32
    %c0_i32_0 = arith.constant 0 : i32
    %c0_i32_1 = arith.constant 0 : i32
    return %c0_i32, %c0_i32_0 : i32, i32
  }
  func.func @transform_4(%arg0: i32) -> (i32, i32) {
    %c0_i32 = arith.constant 0 : i32
    %c0_i32_0 = arith.constant 0 : i32
    %c0_i32_1 = arith.constant 0 : i32
    return %c0_i32, %c0_i32_0 : i32, i32
  }
  func.func @transform_5(%arg0: i32) -> (i32, i32) {
    %c0_i32 = arith.constant 0 : i32
    %c0_i32_0 = arith.constant 0 : i32
    %c0_i32_1 = arith.constant 0 : i32
    return %c0_i32, %c0_i32_0 : i32, i32
  }
  func.func @transform_6(%arg0: i32) -> (i32, i32) {
    %c0_i32 = arith.constant 0 : i32
    %c0_i32_0 = arith.constant 0 : i32
    return %arg0, %c0_i32 : i32, i32
  }
}

</mosaic_0001>

<bundles_post_ra>
// kernel: res2d_block_forward.3
= control target key start
LH: loop header
LB: loop body
LE: loop exit
PB: predicated region body
PF: predicated region fallthrough
CT: control target
= control target key end

     0   :  { %vm137_vm0 = vcmask 392192   ;;  %v592_v11 = vmov 0.0   ;;  %s701_s1 = inlined_call_operand.vmem [shape: bf16[48,128], index: 1, kind: input, shape index: {}]   ;;  %s702_s0 = inlined_call_operand.vmem [shape: bf16[128,48], index: 0, kind: input, shape index: {}]   ;;  %s703_s3 = inlined_call_operand.vmem [shape: f32[1,1,128], index: 3, kind: output, shape index: {1}]   ;;  %s704_s4 = inlined_call_operand.vmem [shape: f32[1,1,128], index: 4, kind: output, shape index: {2}]   ;;  %s705_s2 = inlined_call_operand.vmem [shape: bf16[128,128], index: 2, kind: output, shape index: {0}]  }
   0x1   :  { %v581_v0 = vld [vmem:[%s701_s1 + $0x10] sm:$0xff]   ;;  %v582_v1 = vld [vmem:[%s701_s1 + $0x8] sm:$0xff]   ;;  %v584_v2 = vld [vmem:[%s702_s0] sm:$0xff]   ;;  %55 = vst [vmem:[%s703_s3] sm:$0x1] %v592_v11 }
   0x2   :  { %552 = vmatprep.subr.bf16.mxu0 %v581_v0  ;;  %574 = vmatprep.subr.bf16.mxu1 %v581_v0  ;;  %v583_v3 = vld [vmem:[%s701_s1] sm:$0xff]   ;;  %v585_v5 = vld [vmem:[%s702_s0 + $0x8] sm:$0xff]   ;;  %v586_v7 = vld [vmem:[%s702_s0 + $0x10] sm:$0xff]   ;;  %56 = vst [vmem:[%s704_s4] sm:$0x1] %v592_v11 }
   0x3   :  { %553 = vmatpush3.bf16.msra.mxu0 %v581_v0  ;;  %577 = vmatpush3.bf16.msra.mxu1 %v581_v0  ;;  %v588_v4 = vld [vmem:[%s702_s0 + $0x20] sm:$0xff]   ;;  %v589_v6 = vld [vmem:[%s702_s0 + $0x28] sm:$0xff]   ;;  %v590_v8 = vld [vmem:[%s702_s0 + $0x30] sm:$0xff]  }
   0x4   :  { %554 = vmatprep.subr.bf16.mxu0 %v582_v1  ;;  %575 = vmatprep.subr.bf16.mxu1 %v582_v1  ;;  %v587_v9 = vld [vmem:[%s702_s0 + $0x18] sm:$0xff]  }
   0x5   :  { %558 = vmatprep.mubr.msk.bf16.mxu0 %vm137_vm0, %v584_v2  ;;  %566 = vmatprep.mubr.msk.bf16.mxu1 %vm137_vm0, %v588_v4  ;;  %v591_v10 = vld [vmem:[%s702_s0 + $0x38] sm:$0xff]  }
   0x7   :  { %555 = vmatpush3.bf16.msra.mxu0 %v582_v1  ;;  %578 = vmatpush3.bf16.msra.mxu1 %v582_v1 }
   0x8   :  { %556 = vmatprep.subr.bf16.mxu0 %v583_v3  ;;  %576 = vmatprep.subr.bf16.mxu1 %v583_v3 }
   0xb   :  { %557 = vmatpush3.bf16.msra.mxu0 %v583_v3  ;;  %579 = vmatpush3.bf16.msra.mxu1 %v583_v3 }
   0xe   :  { %559 = vmatmul.mubr.msk.bf16.vlgmr.msra.gmra.mxu0 %vm137_vm0, %v585_v5  ;;  %567 = vmatmul.mubr.msk.bf16.vlgmr.msra.gmra.mxu1 %vm137_vm0, %v589_v6 }
   0xf   :  { %562 = vmatprep.mubr.msk.bf16.mxu0 %vm137_vm0, %v586_v7  ;;  %570 = vmatprep.mubr.msk.bf16.mxu1 %vm137_vm0, %v590_v8 }
  0x16   :  { %563 = vmatmul.mubr.msk.bf16.gmra.mxu0 %vm137_vm0, %v587_v9  ;;  %571 = vmatmul.mubr.msk.bf16.gmra.mxu1 %vm137_vm0, %v591_v10 }
  0xce   :  { %v560_v12 = vpop.f32.mrf.mxu0  ;;  %v568_v13 = vpop.f32.mrf.mxu1 }
  0xcf   :  { %v366_v29 = vmul.f32 %v560_v12, %v560_v12  ;;  %v374_v63 = vmul.f32 %v568_v13, %v568_v13 }
  0xd0   :  { %v196_v14 = vpop.f32.mrf.mxu0  ;;  %v228_v15 = vpop.f32.mrf.mxu1 }
  0xd1   :  { %v364_v20 = vmul.f32 %v196_v14, %v196_v14  ;;  %v372_v57 = vmul.f32 %v228_v15, %v228_v15 }
  0xd2   :  { %v561_v16 = vpop.f32.mrf.mxu0  ;;  %v569_v17 = vpop.f32.mrf.mxu1 }
  0xd3   :  { %v502_v18 = vpack.c.bf16 %v561_v16, %v560_v12  ;;  %v522_v19 = vpack.c.bf16 %v569_v17, %v568_v13  ;;  %v367_v34 = vmul.f32 %v561_v16, %v561_v16  ;;  %v375_v2 = vmul.f32 %v569_v17, %v569_v17 }
  0xd4   :  { %v199_v21 = vpop.f32.mrf.mxu0  ;;  %v231_v22 = vpop.f32.mrf.mxu1 }
  0xd5   :  { %534 = vst [vmem:[%s705_s2 + $0x8] sm:$0xff] %v502_v18   ;;  %v497_v23 = vpack.c.bf16 %v199_v21, %v196_v14  ;;  %v340_v24 = vadd.f32 %v199_v21, %v196_v14  ;;  %v365_v25 = vmul.f32 %v199_v21, %v199_v21  ;;  %538 = vst [vmem:[%s705_s2 + $0x28] sm:$0xff] %v522_v19  }
  0xd6   :  { %v517_v26 = vpack.c.bf16 %v231_v22, %v228_v15  ;;  %v564_v27 = vpop.f32.mrf.mxu0  ;;  %v572_v28 = vpop.f32.mrf.mxu1  ;;  %v373_v61 = vmul.f32 %v231_v22, %v231_v22 }
  0xd7   :  { %498 = vst [vmem:[%s705_s2] sm:$0xff] %v497_v23   ;;  %v341_v30 = vadd.f32 %v560_v12, %v340_v24  ;;  %v380_v31 = vadd.f32 %v365_v25, %v364_v20  ;;  %v370_v51 = vmul.f32 %v564_v27, %v564_v27  ;;  %v378_v11 = vmul.f32 %v572_v28, %v572_v28 }
  0xd8   :  { %537 = vst [vmem:[%s705_s2 + $0x20] sm:$0xff] %v517_v26   ;;  %v212_v32 = vpop.f32.mrf.mxu0  ;;  %v244_v33 = vpop.f32.mrf.mxu1 }
  0xd9   :  { %v381_v35 = vadd.f32 %v380_v31, %v366_v29  ;;  %v342_v36 = vadd.f32 %v561_v16, %v341_v30  ;;  %v368_v40 = vmul.f32 %v212_v32, %v212_v32  ;;  %v376_v6 = vmul.f32 %v244_v33, %v244_v33  ;;  %v363_v30 = vld [vmem:[%s704_s4] sm:$0x1] }
  0xda   :  { %v565_v37 = vpop.f32.mrf.mxu0  ;;  %v573_v38 = vpop.f32.mrf.mxu1 }
  0xdb   :  { %v343_v39 = vadd.f32 %v342_v36, %v212_v32  ;;  %v382_v41 = vadd.f32 %v381_v35, %v367_v34  ;;  %v512_v42 = vpack.c.bf16 %v565_v37, %v564_v27  ;;  %v532_v44 = vpack.c.bf16 %v573_v38, %v572_v28 }
  0xdc   :  { %v215_v43 = vpop.f32.mrf.mxu0  ;;  %v247_v45 = vpop.f32.mrf.mxu1  ;;  %v371_v54 = vmul.f32 %v565_v37, %v565_v37  ;;  %v379_v16 = vmul.f32 %v573_v38, %v573_v38 }
  0xdd   :  { %v383_v46 = vadd.f32 %v382_v41, %v368_v40  ;;  %536 = vst [vmem:[%s705_s2 + $0x18] sm:$0xff] %v512_v42   ;;  %v507_v47 = vpack.c.bf16 %v215_v43, %v212_v32  ;;  %v344_v48 = vadd.f32 %v343_v39, %v215_v43  ;;  %v369_v49 = vmul.f32 %v215_v43, %v215_v43 }
  0xde   :  { %540 = vst [vmem:[%s705_s2 + $0x38] sm:$0xff] %v532_v44   ;;  %v527_v50 = vpack.c.bf16 %v247_v45, %v244_v33  ;;  %v377_v10 = vmul.f32 %v247_v45, %v247_v45 }
  0xdf   :  { %535 = vst [vmem:[%s705_s2 + $0x10] sm:$0xff] %v507_v47   ;;  %v345_v52 = vadd.f32 %v564_v27, %v344_v48  ;;  %v384_v53 = vadd.f32 %v383_v46, %v369_v49  ;;  %v339_v27 = vld [vmem:[%s703_s3] sm:$0x1] }
  0xe0   :  { %539 = vst [vmem:[%s705_s2 + $0x30] sm:$0xff] %v527_v50  }
  0xe1   :  { %v346_v55 = vadd.f32 %v565_v37, %v345_v52  ;;  %v385_v56 = vadd.f32 %v384_v53, %v370_v51 }
  0xe3   :  { %v386_v58 = vadd.f32 %v385_v56, %v371_v54  ;;  %v347_v59 = vadd.f32 %v346_v55, %v228_v15 }
  0xe5   :  { %v348_v60 = vadd.f32 %v347_v59, %v231_v22  ;;  %v387_v62 = vadd.f32 %v386_v58, %v372_v57 }
  0xe7   :  { %v349_v0 = vadd.f32 %v568_v13, %v348_v60  ;;  %v388_v1 = vadd.f32 %v387_v62, %v373_v61 }
  0xe9   :  { %v389_v3 = vadd.f32 %v388_v1, %v374_v63  ;;  %v350_v4 = vadd.f32 %v569_v17, %v349_v0 }
  0xeb   :  { %v351_v5 = vadd.f32 %v350_v4, %v244_v33  ;;  %v390_v7 = vadd.f32 %v389_v3, %v375_v2 }
  0xed   :  { %v391_v8 = vadd.f32 %v390_v7, %v376_v6  ;;  %v352_v9 = vadd.f32 %v351_v5, %v247_v45 }
  0xef   :  { %v353_v12 = vadd.f32 %v572_v28, %v352_v9  ;;  %v392_v14 = vadd.f32 %v391_v8, %v377_v10 }
  0xf1   :  { %v354_v15 = vadd.f32 %v573_v38, %v353_v12  ;;  %v393_v18 = vadd.f32 %v392_v14, %v378_v11 }
  0xf3   :  { %v355_v19 = vrot.slane %v354_v15, 4  ;;  %v394_v20 = vadd.f32 %v393_v18, %v379_v16 }
  0xf5   :  { %v356_v21 = vadd.f32 %v355_v19, %v354_v15  ;;  %v395_v13 = vrot.slane %v394_v20, 4 }
  0xf7   :  { %v357_v22 = vrot.slane %v356_v21, 2  ;;  %v396_v23 = vadd.f32 %v395_v13, %v394_v20 }
  0xf9   :  { %v358_v24 = vadd.f32 %v357_v22, %v356_v21  ;;  %v397_v17 = vrot.slane %v396_v23, 2 }
  0xfb   :  { %v359_v25 = vrot.slane %v358_v24, 1  ;;  %v398_v26 = vadd.f32 %v397_v17, %v396_v23 }
  0xfd   :  { %v360_v29 = vadd.f32 %v359_v25, %v358_v24  ;;  %v399_v28 = vrot.slane %v398_v26, 1 }
  0xff   :  { %v361_v31 = vadd.f32 %v360_v29, %v339_v27  ;;  %v400_v32 = vadd.f32 %v399_v28, %v398_v26 }
 0x101   :  { %362 = vst [vmem:[%s703_s3] sm:$0x1] %v361_v31  ;;  %v401_v33 = vadd.f32 %v400_v32, %v363_v30 }
 0x103   :  { %402 = vst [vmem:[%s704_s4] sm:$0x1] %v401_v33 }

// kernel: res2d_block_forward.4
= control target key start
LH: loop header
LB: loop body
LE: loop exit
PB: predicated region body
PF: predicated region fallthrough
CT: control target
= control target key end

     0   :  { %vm153_vm0 = vcmask 654336   ;;  %v622_v13 = vmov 0.0   ;;  %s737_s1 = inlined_call_operand.vmem [shape: bf16[80,128], index: 1, kind: input, shape index: {}]   ;;  %s738_s0 = inlined_call_operand.vmem [shape: bf16[128,80], index: 0, kind: input, shape index: {}]   ;;  %s739_s3 = inlined_call_operand.vmem [shape: f32[1,1,128], index: 3, kind: output, shape index: {1}]   ;;  %s740_s4 = inlined_call_operand.vmem [shape: f32[1,1,128], index: 4, kind: output, shape index: {2}]   ;;  %s741_s2 = inlined_call_operand.vmem [shape: bf16[128,128], index: 2, kind: output, shape index: {0}]  }
   0x1   :  { %v609_v0 = vld [vmem:[%s737_s1 + $0x20] sm:$0xff]   ;;  %v610_v1 = vld [vmem:[%s737_s1 + $0x18] sm:$0xff]   ;;  %v611_v2 = vld [vmem:[%s737_s1 + $0x10] sm:$0xff]   ;;  %55 = vst [vmem:[%s739_s3] sm:$0x1] %v622_v13 }
   0x2   :  { %572 = vmatprep.subr.bf16.mxu0 %v609_v0  ;;  %598 = vmatprep.subr.bf16.mxu1 %v609_v0  ;;  %v614_v3 = vld [vmem:[%s738_s0] sm:$0xff]   ;;  %v612_v4 = vld [vmem:[%s737_s1 + $0x8] sm:$0xff]   ;;  %v616_v9 = vld [vmem:[%s738_s0 + $0x10] sm:$0xff]   ;;  %56 = vst [vmem:[%s740_s4] sm:$0x1] %v622_v13 }
   0x3   :  { %573 = vmatpush3.bf16.msra.mxu0 %v609_v0  ;;  %603 = vmatpush3.bf16.msra.mxu1 %v609_v0  ;;  %v618_v5 = vld [vmem:[%s738_s0 + $0x20] sm:$0xff]   ;;  %v615_v7 = vld [vmem:[%s738_s0 + $0x8] sm:$0xff]   ;;  %v620_v10 = vld [vmem:[%s738_s0 + $0x30] sm:$0xff]  }
   0x4   :  { %574 = vmatprep.subr.bf16.mxu0 %v610_v1  ;;  %599 = vmatprep.subr.bf16.mxu1 %v610_v1  ;;  %v613_v6 = vld [vmem:[%s737_s1] sm:$0xff]   ;;  %v619_v8 = vld [vmem:[%s738_s0 + $0x28] sm:$0xff]   ;;  %v617_v11 = vld [vmem:[%s738_s0 + $0x18] sm:$0xff]  }
   0x5   :  { %582 = vmatprep.mubr.msk.bf16.mxu0 %vm153_vm0, %v614_v3  ;;  %590 = vmatprep.mubr.msk.bf16.mxu1 %vm153_vm0, %v618_v5  ;;  %v621_v12 = vld [vmem:[%s738_s0 + $0x38] sm:$0xff]  }
   0x7   :  { %575 = vmatpush3.bf16.msra.mxu0 %v610_v1  ;;  %604 = vmatpush3.bf16.msra.mxu1 %v610_v1 }
   0x8   :  { %576 = vmatprep.subr.bf16.mxu0 %v611_v2  ;;  %600 = vmatprep.subr.bf16.mxu1 %v611_v2 }
   0xb   :  { %577 = vmatpush3.bf16.msra.mxu0 %v611_v2  ;;  %605 = vmatpush3.bf16.msra.mxu1 %v611_v2 }
   0xc   :  { %578 = vmatprep.subr.bf16.mxu0 %v612_v4  ;;  %601 = vmatprep.subr.bf16.mxu1 %v612_v4 }
   0xf   :  { %579 = vmatpush3.bf16.msra.mxu0 %v612_v4  ;;  %606 = vmatpush3.bf16.msra.mxu1 %v612_v4 }
  0x10   :  { %580 = vmatprep.subr.bf16.mxu0 %v613_v6  ;;  %602 = vmatprep.subr.bf16.mxu1 %v613_v6 }
  0x13   :  { %581 = vmatpush3.bf16.msra.mxu0 %v613_v6  ;;  %607 = vmatpush3.bf16.msra.mxu1 %v613_v6 }
  0x16   :  { %583 = vmatmul.mubr.msk.bf16.vlgmr.msra.gmra.mxu0 %vm153_vm0, %v615_v7  ;;  %591 = vmatmul.mubr.msk.bf16.vlgmr.msra.gmra.mxu1 %vm153_vm0, %v619_v8 }
  0x17   :  { %586 = vmatprep.mubr.msk.bf16.mxu0 %vm153_vm0, %v616_v9  ;;  %594 = vmatprep.mubr.msk.bf16.mxu1 %vm153_vm0, %v620_v10 }
  0x1e   :  { %587 = vmatmul.mubr.msk.bf16.gmra.mxu0 %vm153_vm0, %v617_v11  ;;  %595 = vmatmul.mubr.msk.bf16.gmra.mxu1 %vm153_vm0, %v621_v12 }
  0xd6   :  { %v584_v14 = vpop.f32.mrf.mxu0  ;;  %v592_v15 = vpop.f32.mrf.mxu1 }
  0xd7   :  { %v382_v31 = vmul.f32 %v584_v14, %v584_v14  ;;  %v390_v1 = vmul.f32 %v592_v15, %v592_v15 }
  0xd8   :  { %v212_v16 = vpop.f32.mrf.mxu0  ;;  %v244_v17 = vpop.f32.mrf.mxu1 }
  0xd9   :  { %v380_v22 = vmul.f32 %v212_v16, %v212_v16  ;;  %v388_v59 = vmul.f32 %v244_v17, %v244_v17 }
  0xda   :  { %v585_v18 = vpop.f32.mrf.mxu0  ;;  %v593_v19 = vpop.f32.mrf.mxu1 }
  0xdb   :  { %v520_v20 = vpack.c.bf16 %v585_v18, %v584_v14  ;;  %v540_v21 = vpack.c.bf16 %v593_v19, %v592_v15  ;;  %v383_v36 = vmul.f32 %v585_v18, %v585_v18  ;;  %v391_v4 = vmul.f32 %v593_v19, %v593_v19 }
  0xdc   :  { %v215_v23 = vpop.f32.mrf.mxu0  ;;  %v247_v24 = vpop.f32.mrf.mxu1 }
  0xdd   :  { %552 = vst [vmem:[%s741_s2 + $0x8] sm:$0xff] %v520_v20   ;;  %v515_v25 = vpack.c.bf16 %v215_v23, %v212_v16  ;;  %v356_v26 = vadd.f32 %v215_v23, %v212_v16  ;;  %v381_v27 = vmul.f32 %v215_v23, %v215_v23  ;;  %556 = vst [vmem:[%s741_s2 + $0x28] sm:$0xff] %v540_v21  }
  0xde   :  { %v535_v28 = vpack.c.bf16 %v247_v24, %v244_v17  ;;  %v588_v29 = vpop.f32.mrf.mxu0  ;;  %v596_v30 = vpop.f32.mrf.mxu1  ;;  %v389_v63 = vmul.f32 %v247_v24, %v247_v24 }
  0xdf   :  { %516 = vst [vmem:[%s741_s2] sm:$0xff] %v515_v25   ;;  %v357_v32 = vadd.f32 %v584_v14, %v356_v26  ;;  %v396_v33 = vadd.f32 %v381_v27, %v380_v22  ;;  %v386_v53 = vmul.f32 %v588_v29, %v588_v29  ;;  %v394_v13 = vmul.f32 %v596_v30, %v596_v30 }
  0xe0   :  { %555 = vst [vmem:[%s741_s2 + $0x20] sm:$0xff] %v535_v28   ;;  %v228_v34 = vpop.f32.mrf.mxu0  ;;  %v260_v35 = vpop.f32.mrf.mxu1 }
  0xe1   :  { %v397_v37 = vadd.f32 %v396_v33, %v382_v31  ;;  %v358_v38 = vadd.f32 %v585_v18, %v357_v32  ;;  %v384_v42 = vmul.f32 %v228_v34, %v228_v34  ;;  %v392_v8 = vmul.f32 %v260_v35, %v260_v35  ;;  %v379_v32 = vld [vmem:[%s740_s4] sm:$0x1] }
  0xe2   :  { %v589_v39 = vpop.f32.mrf.mxu0  ;;  %v597_v40 = vpop.f32.mrf.mxu1 }
  0xe3   :  { %v359_v41 = vadd.f32 %v358_v38, %v228_v34  ;;  %v398_v43 = vadd.f32 %v397_v37, %v383_v36  ;;  %v530_v44 = vpack.c.bf16 %v589_v39, %v588_v29  ;;  %v550_v46 = vpack.c.bf16 %v597_v40, %v596_v30 }
  0xe4   :  { %v231_v45 = vpop.f32.mrf.mxu0  ;;  %v263_v47 = vpop.f32.mrf.mxu1  ;;  %v387_v56 = vmul.f32 %v589_v39, %v589_v39  ;;  %v395_v18 = vmul.f32 %v597_v40, %v597_v40 }
  0xe5   :  { %v399_v48 = vadd.f32 %v398_v43, %v384_v42  ;;  %554 = vst [vmem:[%s741_s2 + $0x18] sm:$0xff] %v530_v44   ;;  %v525_v49 = vpack.c.bf16 %v231_v45, %v228_v34  ;;  %v360_v50 = vadd.f32 %v359_v41, %v231_v45  ;;  %v385_v51 = vmul.f32 %v231_v45, %v231_v45 }
  0xe6   :  { %558 = vst [vmem:[%s741_s2 + $0x38] sm:$0xff] %v550_v46   ;;  %v545_v52 = vpack.c.bf16 %v263_v47, %v260_v35  ;;  %v393_v12 = vmul.f32 %v263_v47, %v263_v47 }
  0xe7   :  { %553 = vst [vmem:[%s741_s2 + $0x10] sm:$0xff] %v525_v49   ;;  %v361_v54 = vadd.f32 %v588_v29, %v360_v50  ;;  %v400_v55 = vadd.f32 %v399_v48, %v385_v51  ;;  %v355_v29 = vld [vmem:[%s739_s3] sm:$0x1] }
  0xe8   :  { %557 = vst [vmem:[%s741_s2 + $0x30] sm:$0xff] %v545_v52  }
  0xe9   :  { %v362_v57 = vadd.f32 %v589_v39, %v361_v54  ;;  %v401_v58 = vadd.f32 %v400_v55, %v386_v53 }
  0xeb   :  { %v402_v60 = vadd.f32 %v401_v58, %v387_v56  ;;  %v363_v61 = vadd.f32 %v362_v57, %v244_v17 }
  0xed   :  { %v364_v62 = vadd.f32 %v363_v61, %v247_v24  ;;  %v403_v0 = vadd.f32 %v402_v60, %v388_v59 }
  0xef   :  { %v365_v2 = vadd.f32 %v592_v15, %v364_v62  ;;  %v404_v3 = vadd.f32 %v403_v0, %v389_v63 }
  0xf1   :  { %v405_v5 = vadd.f32 %v404_v3, %v390_v1  ;;  %v366_v6 = vadd.f32 %v593_v19, %v365_v2 }
  0xf3   :  { %v367_v7 = vadd.f32 %v366_v6, %v260_v35  ;;  %v406_v9 = vadd.f32 %v405_v5, %v391_v4 }
  0xf5   :  { %v407_v10 = vadd.f32 %v406_v9, %v392_v8  ;;  %v368_v11 = vadd.f32 %v367_v7, %v263_v47 }
  0xf7   :  { %v369_v14 = vadd.f32 %v596_v30, %v368_v11  ;;  %v408_v16 = vadd.f32 %v407_v10, %v393_v12 }
  0xf9   :  { %v370_v17 = vadd.f32 %v597_v40, %v369_v14  ;;  %v409_v20 = vadd.f32 %v408_v16, %v394_v13 }
  0xfb   :  { %v371_v21 = vrot.slane %v370_v17, 4  ;;  %v410_v22 = vadd.f32 %v409_v20, %v395_v18 }
  0xfd   :  { %v372_v23 = vadd.f32 %v371_v21, %v370_v17  ;;  %v411_v15 = vrot.slane %v410_v22, 4 }
  0xff   :  { %v373_v24 = vrot.slane %v372_v23, 2  ;;  %v412_v25 = vadd.f32 %v411_v15, %v410_v22 }
 0x101   :  { %v374_v26 = vadd.f32 %v373_v24, %v372_v23  ;;  %v413_v19 = vrot.slane %v412_v25, 2 }
 0x103   :  { %v375_v27 = vrot.slane %v374_v26, 1  ;;  %v414_v28 = vadd.f32 %v413_v19, %v412_v25 }
 0x105   :  { %v376_v31 = vadd.f32 %v375_v27, %v374_v26  ;;  %v415_v30 = vrot.slane %v414_v28, 1 }
 0x107   :  { %v377_v33 = vadd.f32 %v376_v31, %v355_v29  ;;  %v416_v34 = vadd.f32 %v415_v30, %v414_v28 }
 0x109   :  { %378 = vst [vmem:[%s739_s3] sm:$0x1] %v377_v33  ;;  %v417_v35 = vadd.f32 %v416_v34, %v379_v32 }
 0x10b   :  { %418 = vst [vmem:[%s740_s4] sm:$0x1] %v417_v35 }

// kernel: res2d_block_forward.5
= control target key start
LH: loop header
LB: loop body
LE: loop exit
PB: predicated region body
PF: predicated region fallthrough
CT: control target
= control target key end

     0   :  { %s528_s0 = inlined_call_operand.vmem [shape: bf16[128,128], index: 0, kind: input, shape index: {}]   ;;  %s529_s1 = inlined_call_operand.vmem [shape: bf16[128,128], index: 1, kind: input, shape index: {}]   ;;  %s530_s2 = inlined_call_operand.vmem [shape: f32[1,128], index: 2, kind: input, shape index: {}]   ;;  %s531_s3 = inlined_call_operand.vmem [shape: f32[1,128], index: 3, kind: input, shape index: {}]   ;;  %s532_s4 = inlined_call_operand.vmem [shape: f32[1,128], index: 4, kind: input, shape index: {}]   ;;  %s533_s5 = inlined_call_operand.vmem [shape: f32[1,128], index: 5, kind: input, shape index: {}]   ;;  %s534_s6 = inlined_call_operand.vmem [shape: f32[128,128], index: 6, kind: output, shape index: {}]  }
   0x1   :  { %v236_v0 = vld [vmem:[%s528_s0] sm:$0xff]   ;;  %v299_v9 = vld [vmem:[%s528_s0 + $0x8] sm:$0xff]   ;;  %v300_v20 = vld [vmem:[%s528_s0 + $0x10] sm:$0xff]  }
   0x2   :  { %v354_v1 = vld [vmem:[%s530_s2] ss:$0 sm:$0xff]  ;;  %v237_v2 = vunpack.c.l.bf16 %v236_v0  ;;  %v238_v5 = vunpack.c.h.bf16 %v236_v0  ;;  %v306_v10 = vld [vmem:[%s529_s1 + $0x8] sm:$0xff]   ;;  %v241_v14 = vunpack.c.l.bf16 %v299_v9  ;;  %v242_v18 = vunpack.c.h.bf16 %v299_v9  ;;  %v307_v21 = vld [vmem:[%s529_s1 + $0x10] sm:$0xff]  }
   0x3   :  { %v268_v3 = vld [vmem:[%s529_s1] sm:$0xff]   ;;  %v273_v15 = vunpack.c.l.bf16 %v306_v10  ;;  %v274_v19 = vunpack.c.h.bf16 %v306_v10  ;;  %v245_v32 = vunpack.c.l.bf16 %v300_v20  ;;  %v277_v33 = vunpack.c.l.bf16 %v307_v21  ;;  %v301_v42 = vld [vmem:[%s528_s0 + $0x18] sm:$0xff]  }
   0x4   :  { %v362_v4 = vld [vmem:[%s532_s4] ss:$0 sm:$0xff]  ;;  %v269_v7 = vunpack.c.l.bf16 %v268_v3  ;;  %v270_v8 = vunpack.c.h.bf16 %v268_v3  ;;  %v62_v11 = vmul.f32 %v237_v2, %v354_v1  ;;  %v63_v13 = vmul.f32 %v238_v5, %v354_v1  ;;  %v308_v43 = vld [vmem:[%s529_s1 + $0x18] sm:$0xff]  }
   0x5   :  { %v367_v6 = vld [vmem:[%s531_s3] ss:$0 sm:$0xff]  ;;  %v64_v24 = vmul.f32 %v241_v14, %v354_v1  ;;  %v142_v25 = vmul.f32 %v273_v15, %v362_v4  ;;  %v65_v28 = vmul.f32 %v242_v18, %v354_v1  ;;  %v143_v29 = vmul.f32 %v274_v19, %v362_v4  ;;  %v303_v14 = vld [vmem:[%s528_s0 + $0x28] sm:$0xff]  }
   0x6   :  { %v379_v12 = vld [vmem:[%s533_s5] ss:$0 sm:$0xff]  ;;  %v140_v16 = vmul.f32 %v269_v7, %v362_v4  ;;  %v141_v17 = vmul.f32 %v270_v8, %v362_v4  ;;  %v85_v22 = vadd.f32 %v367_v6, %v62_v11  ;;  %v86_v23 = vadd.f32 %v367_v6, %v63_v13  ;;  %v310_v19 = vld [vmem:[%s529_s1 + $0x28] sm:$0xff]  }
   0x7   :  { %v87_v30 = vadd.f32 %v367_v6, %v64_v24  ;;  %v165_v31 = vadd.f32 %v379_v12, %v142_v25  ;;  %v88_v36 = vadd.f32 %v367_v6, %v65_v28  ;;  %v166_v37 = vadd.f32 %v379_v12, %v143_v29  ;;  %v302_v52 = vld [vmem:[%s528_s0 + $0x20] sm:$0xff]  }
   0x8   :  { %v163_v26 = vadd.f32 %v379_v12, %v140_v16  ;;  %v164_v27 = vadd.f32 %v379_v12, %v141_v17  ;;  %v66_v39 = vmul.f32 %v245_v32, %v354_v1  ;;  %v144_v40 = vmul.f32 %v277_v33, %v362_v4  ;;  %v309_v57 = vld [vmem:[%s529_s1 + $0x20] sm:$0xff]   ;;  %v304_v32 = vld [vmem:[%s528_s0 + $0x30] sm:$0xff]  }
   0x9   :  { %v181_v38 = vadd.f32 %v165_v31, %v87_v30  ;;  %v246_v41 = vunpack.c.h.bf16 %v300_v20  ;;  %v182_v46 = vadd.f32 %v166_v37, %v88_v36  ;;  %v278_v47 = vunpack.c.h.bf16 %v307_v21  ;;  %v311_v33 = vld [vmem:[%s529_s1 + $0x30] sm:$0xff]  }
   0xa   :  { %v179_v34 = vadd.f32 %v163_v26, %v85_v22  ;;  %v180_v35 = vadd.f32 %v164_v27, %v86_v23  ;;  %v89_v49 = vadd.f32 %v367_v6, %v66_v39  ;;  %v167_v50 = vadd.f32 %v379_v12, %v144_v40 }
   0xb   :  { %v197_v48 = vmax.f32 %v181_v38, 0.0  ;;  %v67_v51 = vmul.f32 %v246_v41, %v354_v1  ;;  %v198_v53 = vmax.f32 %v182_v46, 0.0  ;;  %v145_v54 = vmul.f32 %v278_v47, %v362_v4  ;;  %v305_v46 = vld [vmem:[%s528_s0 + $0x38] sm:$0xff]  }
   0xc   :  { %v195_v44 = vmax.f32 %v179_v34, 0.0  ;;  %v196_v45 = vmax.f32 %v180_v35, 0.0  ;;  %v249_v55 = vunpack.c.l.bf16 %v301_v42  ;;  %v281_v56 = vunpack.c.l.bf16 %v308_v43 }
   0xd   :  { %213 = vst [vmem:[%s534_s6 + $0x10] sm:$0xff] %v197_v48  ;;  %v183_v58 = vadd.f32 %v167_v50, %v89_v49  ;;  %v90_v59 = vadd.f32 %v367_v6, %v67_v51  ;;  %v250_v60 = vunpack.c.h.bf16 %v301_v42  ;;  %v282_v61 = vunpack.c.h.bf16 %v308_v43  ;;  %214 = vst [vmem:[%s534_s6 + $0x18] sm:$0xff] %v198_v53 }
   0xe   :  { %211 = vst [vmem:[%s534_s6] sm:$0xff] %v195_v44  ;;  %212 = vst [vmem:[%s534_s6 + $0x8] sm:$0xff] %v196_v45  ;;  %v168_v62 = vadd.f32 %v379_v12, %v145_v54  ;;  %v68_v63 = vmul.f32 %v249_v55, %v354_v1  ;;  %v146_v0 = vmul.f32 %v281_v56, %v362_v4  ;;  %v253_v2 = vunpack.c.l.bf16 %v302_v52  ;;  %v312_v55 = vld [vmem:[%s529_s1 + $0x38] sm:$0xff]  }
   0xf   :  { %v199_v3 = vmax.f32 %v183_v58, 0.0  ;;  %v69_v5 = vmul.f32 %v250_v60, %v354_v1  ;;  %v147_v7 = vmul.f32 %v282_v61, %v362_v4  ;;  %v285_v8 = vunpack.c.l.bf16 %v309_v57 }
  0x10   :  { %v184_v9 = vadd.f32 %v168_v62, %v90_v59  ;;  %v91_v10 = vadd.f32 %v367_v6, %v68_v63  ;;  %v169_v11 = vadd.f32 %v379_v12, %v146_v0  ;;  %v70_v13 = vmul.f32 %v253_v2, %v354_v1 }
  0x11   :  { %215 = vst [vmem:[%s534_s6 + $0x20] sm:$0xff] %v199_v3  ;;  %v92_v15 = vadd.f32 %v367_v6, %v69_v5  ;;  %v170_v16 = vadd.f32 %v379_v12, %v147_v7  ;;  %v148_v17 = vmul.f32 %v285_v8, %v362_v4  ;;  %v254_v18 = vunpack.c.h.bf16 %v302_v52 }
  0x12   :  { %v200_v20 = vmax.f32 %v184_v9, 0.0  ;;  %v185_v21 = vadd.f32 %v169_v11, %v91_v10  ;;  %v93_v22 = vadd.f32 %v367_v6, %v70_v13  ;;  %v286_v23 = vunpack.c.h.bf16 %v309_v57 }
  0x13   :  { %v186_v24 = vadd.f32 %v170_v16, %v92_v15  ;;  %v171_v25 = vadd.f32 %v379_v12, %v148_v17  ;;  %v71_v26 = vmul.f32 %v254_v18, %v354_v1  ;;  %v257_v27 = vunpack.c.l.bf16 %v303_v14 }
  0x14   :  { %216 = vst [vmem:[%s534_s6 + $0x28] sm:$0xff] %v200_v20  ;;  %v201_v28 = vmax.f32 %v185_v21, 0.0  ;;  %v149_v29 = vmul.f32 %v286_v23, %v362_v4  ;;  %v289_v30 = vunpack.c.l.bf16 %v310_v19  ;;  %v258_v31 = vunpack.c.h.bf16 %v303_v14 }
  0x15   :  { %v202_v34 = vmax.f32 %v186_v24, 0.0  ;;  %v187_v35 = vadd.f32 %v171_v25, %v93_v22  ;;  %v94_v36 = vadd.f32 %v367_v6, %v71_v26  ;;  %v72_v37 = vmul.f32 %v257_v27, %v354_v1 }
  0x16   :  { %217 = vst [vmem:[%s534_s6 + $0x30] sm:$0xff] %v201_v28  ;;  %v172_v38 = vadd.f32 %v379_v12, %v149_v29  ;;  %v150_v39 = vmul.f32 %v289_v30, %v362_v4  ;;  %v73_v40 = vmul.f32 %v258_v31, %v354_v1  ;;  %v290_v41 = vunpack.c.h.bf16 %v310_v19 }
  0x17   :  { %218 = vst [vmem:[%s534_s6 + $0x38] sm:$0xff] %v202_v34  ;;  %v203_v42 = vmax.f32 %v187_v35, 0.0  ;;  %v95_v43 = vadd.f32 %v367_v6, %v72_v37  ;;  %v261_v44 = vunpack.c.l.bf16 %v304_v32  ;;  %v293_v45 = vunpack.c.l.bf16 %v311_v33 }
  0x18   :  { %v188_v47 = vadd.f32 %v172_v38, %v94_v36  ;;  %v173_v48 = vadd.f32 %v379_v12, %v150_v39  ;;  %v96_v49 = vadd.f32 %v367_v6, %v73_v40  ;;  %v151_v50 = vmul.f32 %v290_v41, %v362_v4 }
  0x19   :  { %219 = vst [vmem:[%s534_s6 + $0x40] sm:$0xff] %v203_v42  ;;  %v74_v51 = vmul.f32 %v261_v44, %v354_v1  ;;  %v152_v52 = vmul.f32 %v293_v45, %v362_v4  ;;  %v262_v53 = vunpack.c.h.bf16 %v304_v32  ;;  %v294_v54 = vunpack.c.h.bf16 %v311_v33 }
  0x1a   :  { %v204_v56 = vmax.f32 %v188_v47, 0.0  ;;  %v189_v57 = vadd.f32 %v173_v48, %v95_v43  ;;  %v174_v58 = vadd.f32 %v379_v12, %v151_v50  ;;  %v265_v59 = vunpack.c.l.bf16 %v305_v46 }
  0x1b   :  { %v97_v60 = vadd.f32 %v367_v6, %v74_v51  ;;  %v175_v61 = vadd.f32 %v379_v12, %v152_v52  ;;  %v75_v62 = vmul.f32 %v262_v53, %v354_v1  ;;  %v153_v63 = vmul.f32 %v294_v54, %v362_v4 }
  0x1c   :  { %220 = vst [vmem:[%s534_s6 + $0x48] sm:$0xff] %v204_v56  ;;  %v205_v0 = vmax.f32 %v189_v57, 0.0  ;;  %v190_v2 = vadd.f32 %v174_v58, %v96_v49  ;;  %v76_v3 = vmul.f32 %v265_v59, %v354_v1  ;;  %v297_v5 = vunpack.c.l.bf16 %v312_v55 }
  0x1d   :  { %v191_v7 = vadd.f32 %v175_v61, %v97_v60  ;;  %v98_v8 = vadd.f32 %v367_v6, %v75_v62  ;;  %v176_v9 = vadd.f32 %v379_v12, %v153_v63  ;;  %v266_v10 = vunpack.c.h.bf16 %v305_v46 }
  0x1e   :  { %221 = vst [vmem:[%s534_s6 + $0x50] sm:$0xff] %v205_v0  ;;  %v206_v11 = vmax.f32 %v190_v2, 0.0  ;;  %v99_v13 = vadd.f32 %v367_v6, %v76_v3  ;;  %v154_v14 = vmul.f32 %v297_v5, %v362_v4  ;;  %v298_v15 = vunpack.c.h.bf16 %v312_v55 }
  0x1f   :  { %v207_v16 = vmax.f32 %v191_v7, 0.0  ;;  %v192_v17 = vadd.f32 %v176_v9, %v98_v8  ;;  %v77_v18 = vmul.f32 %v266_v10, %v354_v1 }
  0x20   :  { %222 = vst [vmem:[%s534_s6 + $0x58] sm:$0xff] %v206_v11  ;;  %v177_v19 = vadd.f32 %v379_v12, %v154_v14  ;;  %v155_v20 = vmul.f32 %v298_v15, %v362_v4 }
  0x21   :  { %223 = vst [vmem:[%s534_s6 + $0x60] sm:$0xff] %v207_v16  ;;  %v208_v21 = vmax.f32 %v192_v17, 0.0  ;;  %v100_v22 = vadd.f32 %v367_v6, %v77_v18 }
  0x22   :  { %v193_v23 = vadd.f32 %v177_v19, %v99_v13  ;;  %v178_v24 = vadd.f32 %v379_v12, %v155_v20 }
  0x23   :  { %224 = vst [vmem:[%s534_s6 + $0x68] sm:$0xff] %v208_v21 }
  0x24   :  { %v209_v1 = vmax.f32 %v193_v23, 0.0  ;;  %v194_v25 = vadd.f32 %v178_v24, %v100_v22 }
  0x26   :  { %225 = vst [vmem:[%s534_s6 + $0x70] sm:$0xff] %v209_v1  ;;  %v210_v4 = vmax.f32 %v194_v25, 0.0 }
  0x28   :  { %226 = vst [vmem:[%s534_s6 + $0x78] sm:$0xff] %v210_v4 }

</bundles_post_ra>
